<compile_context>
chip_gen: v5e
topology: v5e:2x2
jax: 0.10.0
libtpu: 0.0.40
codegen_flags: <defaults>
</compile_context>

<pallas_src>
import functools
import math

import jax
import jax.numpy as jnp
from jax.experimental import pallas as pl
from jax.experimental.pallas import tpu as pltpu


def _round_up(x, m):
    return ((x + m - 1) // m) * m


def _graph_loss_kernel(xs_ref, xt_ref, ssb_ref, ws_ref, wd_ref,   # inputs
                       wij_ref, lpart_ref,                        # outputs
                       ssa_ref,                                   # scratch
                       *, scale_same, scale_diff, beta, use_highest):
    j = pl.program_id(1)

    # Once per row-tile: cache ||a_i||^2 and zero the partial-loss block.
    @pl.when(j == 0)
    def _():
        xs32 = xs_ref[...].astype(jnp.float32)
        ssa_ref[...] = jnp.sum(xs32 * xs32, axis=1, keepdims=True)  # (tm, 1)
        lpart_ref[...] = jnp.zeros_like(lpart_ref)

    # A @ B^T on the MXU (contract over D), f32 accumulation.  Precision is
    # pinned to HIGHEST for f32 operands to match the reference numerics.
    precision = jax.lax.Precision.HIGHEST if use_highest else None
    vec_prod = jax.lax.dot_general(
        xs_ref[...], xt_ref[...],
        dimension_numbers=(((1,), (1,)), ((), ())),
        preferred_element_type=jnp.float32,
        precision=precision)                                        # (tm, tn)

    # ||a_i||^2 + ||b_j||^2 - 2 a_i.b_j   (ssb is a precomputed (1, tn) row).
    dist_sq = ssa_ref[...] + ssb_ref[...].astype(jnp.float32) - 2.0 * vec_prod

    a = scale_same * ws_ref[...].astype(jnp.float32)
    b = scale_diff * wd_ref[...].astype(jnp.float32)

    wij_ref[...] = (a + b).astype(wij_ref.dtype)

    # Fused weighted reduction: sum(d*a) - beta*sum(d*b) = sum(d*(a - beta*b)).
    contrib = dist_sq * (a - beta * b)                              # (tm, tn)
    col = jnp.sum(contrib, axis=0, keepdims=True)                   # (1, tn)

    # Fold 128-lane chunks with static, lane-aligned slices (plain VALU adds,
    # no lane-splitting relayout), then accumulate into one lane-dense row.
    tn = contrib.shape[1]
    blk = col[:, 0:128]
    for c in range(1, tn // 128):
        blk = blk + col[:, c * 128:(c + 1) * 128]
    lpart_ref[0:1, :] = lpart_ref[0:1, :] + blk


def graph_modeling_loss(X_source, X_target, W_ij_same, W_ij_different,
                        class_num, beta=0.01):
    M, D = X_source.shape
    N, D2 = X_target.shape
    assert D == D2
    assert W_ij_same.shape == (M, N)
    assert W_ij_different.shape == (M, N)

    # Static scale factors (Python floats, same as the PyTorch module).
    n_same = M * N / class_num
    n_different = M * N * (class_num - 1) / class_num
    scale_same = math.pow(1.0 / n_same, 0.5)
    scale_diff = math.pow(1.0 / n_different, 0.5)

    wij_dtype = jnp.promote_types(W_ij_same.dtype, W_ij_different.dtype)
    x_item = jnp.dtype(X_source.dtype).itemsize
    ws_item = jnp.dtype(W_ij_same.dtype).itemsize
    wd_item = jnp.dtype(W_ij_different.dtype).itemsize
    wij_item = jnp.dtype(wij_dtype).itemsize

    # --- tile selection ------------------------------------------------------
    TM_CAP, TN_CAP = 512, 512
    tn = min(TN_CAP, _round_up(N, 128))
    if M > 8:
        # Keep at least 2 row tiles so the "parallel" i axis shards across
        # the two TensorCores on v7x (harmless on single-TC v5e/v6e).
        tm = min(TM_CAP, _round_up(-(-M // 2), 8))
    else:
        tm = _round_up(M, 8)

    def working_set(tm_, tn_):
        # Double-buffered inputs/outputs + resident scratch, in bytes.
        ins = 2 * (tm_ * D * x_item            # X_source tile
                   + tn_ * D * x_item          # X_target tile
                   + tn_ * 4                   # ssb row (f32)
                   + tm_ * tn_ * ws_item       # W_same tile
                   + tm_ * tn_ * wd_item)      # W_diff tile
        outs = 2 * (tm_ * tn_ * wij_item + 8 * 128 * 4)
        return ins + outs + tm_ * 4

    VMEM_BUDGET = 20 * 1024 * 1024  # conservative: fits v7x's 64 MiB with slack
    while working_set(tm, tn) > VMEM_BUDGET and tn > 128:
        tn = max(128, _round_up(tn // 2, 128))
    while working_set(tm, tn) > VMEM_BUDGET and tm > 8:
        tm = max(8, _round_up(tm // 2, 8))

    Mp = _round_up(M, tm)
    Np = _round_up(N, tn)
    num_i = Mp // tm
    num_j = Np // tn

    def _pad2(x, r, c):
        if x.shape == (r, c):
            return x
        return jnp.pad(x, ((0, r - x.shape[0]), (0, c - x.shape[1])))

    xs = _pad2(X_source, Mp, D)
    xt = _pad2(X_target, Np, D)
    ws = _pad2(W_ij_same, Mp, Np)       # padded entries are 0 -> no loss term
    wd = _pad2(W_ij_different, Mp, Np)
    # Precompute ||b_j||^2 once (padded rows are zero -> ssb is zero there).
    ssb = jnp.sum(xt.astype(jnp.float32) * xt.astype(jnp.float32),
                  axis=1)[None, :]      # (1, Np)

    kernel = functools.partial(
        _graph_loss_kernel,
        scale_same=scale_same,
        scale_diff=scale_diff,
        beta=float(beta),
        use_highest=(jnp.dtype(X_source.dtype) == jnp.float32))

    grid_spec = pltpu.PrefetchScalarGridSpec(
        num_scalar_prefetch=0,
        grid=(num_i, num_j),
        in_specs=[
            pl.BlockSpec((tm, D), lambda i, j: (i, 0)),   # X_source (resident over j)
            pl.BlockSpec((tn, D), lambda i, j: (j, 0)),   # X_target
            pl.BlockSpec((1, tn), lambda i, j: (0, j)),   # ||b||^2 row
            pl.BlockSpec((tm, tn), lambda i, j: (i, j)),  # W_ij_same
            pl.BlockSpec((tm, tn), lambda i, j: (i, j)),  # W_ij_different
        ],
        out_specs=(
            pl.BlockSpec((tm, tn), lambda i, j: (i, j)),  # Wij
            pl.BlockSpec((8, 128), lambda i, j: (i, 0)),  # per-i-tile partial loss
        ),
        scratch_shapes=[pltpu.VMEM((tm, 1), jnp.float32)],
    )

    vmem_limit = int(min(max(1.5 * working_set(tm, tn), 16 * 1024 * 1024),
                         32 * 1024 * 1024))

    bytes_accessed = (x_item * (Mp * D + num_i * Np * D)
                      + 4 * Np * num_i
                      + (ws_item + wd_item) * Mp * Np
                      + wij_item * Mp * Np
                      + 4 * num_i * 8 * 128)
    cost = pl.CostEstimate(flops=2 * Mp * Np * D + 8 * Mp * Np,
                           transcendentals=0,
                           bytes_accessed=int(bytes_accessed))

    wij_padded, lpart = pl.pallas_call(
        kernel,
        out_shape=(
            jax.ShapeDtypeStruct((Mp, Np), wij_dtype),
            jax.ShapeDtypeStruct((num_i * 8, 128), jnp.float32),
        ),
        grid_spec=grid_spec,
        compiler_params=pltpu.CompilerParams(
            dimension_semantics=("parallel", "arbitrary"),
            vmem_limit_bytes=vmem_limit,
        ),
        cost_estimate=cost,
    )(xs, xt, ssb, ws, wd)

    # Each i-tile's (8, 128) block holds its partial loss in row 0 (rest is
    # zero), so a plain sum of the whole lpart array is the total loss.
    loss = jnp.sum(lpart)
    wij = wij_padded[:M, :N]
    return loss, wij


def _reference(X_source, X_target, W_ij_same, W_ij_different, class_num,
               beta=0.01):
    vec_prod = jnp.dot(X_source, X_target.T,
                       precision=jax.lax.Precision.HIGHEST)
    sa = jnp.sum(X_source ** 2, axis=1, keepdims=True)
    sb = jnp.sum(X_target ** 2, axis=1, keepdims=True)
    dist_sq = sa + sb.T - 2.0 * vec_prod
    M, N = dist_sq.shape
    n_same = M * N / class_num
    n_different = M * N * (class_num - 1) / class_num
    wst_same = math.pow(1.0 / n_same, 0.5) * W_ij_same
    wst_diff = math.pow(1.0 / n_different, 0.5) * W_ij_different
    loss = jnp.sum(dist_sq * wst_same) - beta * jnp.sum(dist_sq * wst_diff)
    return loss, wst_same + wst_diff


if __name__ == "__main__":
    key = jax.random.PRNGKey(0)

    def make_case(k, M, N, D):
        k1, k2, k3 = jax.random.split(k, 3)
        Xs = jax.random.normal(k1, (M, D), dtype=jnp.float32)
        Xt = jax.random.normal(k2, (N, D), dtype=jnp.float32)
        Wsame = (jax.random.uniform(k3, (M, N)) > 0.75).astype(jnp.float32)
        Wdiff = 1.0 - Wsame
        return Xs, Xt, Wsame, Wdiff

    # (M, N, D, class_num): a tiny single-tile case, and a multi-tile case
    # exercising num_i >= 2 ("parallel" axis), num_j >= 2 (accumulation over
    # the "arbitrary" axis) and row/column padding with zero weights.
    cases = [(8, 8, 32, 4), (300, 600, 64, 5)]

    for M, N, D, class_num in cases:
        key, sub = jax.random.split(key)
        Xs, Xt, Wsame, Wdiff = make_case(sub, M, N, D)

        loss, wij = graph_modeling_loss(Xs, Xt, Wsame, Wdiff, class_num)
        jax.block_until_ready((loss, wij))

        ref_loss, ref_wij = _reference(Xs, Xt, Wsame, Wdiff, class_num)
        assert jnp.allclose(wij, ref_wij, rtol=1e-5, atol=1e-6), \
            ("Wij mismatch", M, N)
        assert jnp.allclose(loss, ref_loss, rtol=2e-3, atol=1e-2), \
            ("loss mismatch", M, N, float(loss), float(ref_loss))

    print("KERNEL_OK")
</pallas_src>

<mosaic_0001>
module attributes {stable_mosaic.version = 11 : i64} {
  func.func @_graph_loss_kernel(%arg0: i32, %arg1: i32, %arg2: memref<8x32xf32, #tpu.memory_space<vmem>>, %arg3: memref<128x32xf32, #tpu.memory_space<vmem>>, %arg4: memref<1x128xf32, #tpu.memory_space<vmem>>, %arg5: memref<8x128xf32, #tpu.memory_space<vmem>>, %arg6: memref<8x128xf32, #tpu.memory_space<vmem>>, %arg7: memref<8x128xf32, #tpu.memory_space<vmem>>, %arg8: memref<8x128xf32, #tpu.memory_space<vmem>>, %arg9: memref<8x1xf32, #tpu.memory_space<vmem>>) attributes {dimension_semantics = [#tpu.dimension_semantics<parallel>, #tpu.dimension_semantics<arbitrary>], iteration_bounds = array<i64: 1, 1>, scalar_prefetch = 0 : i64, scratch_operands = 1 : i64, tpu.core_type = #tpu.core_type<tc>, window_params = [{transform_indices = @transform_0, window_bounds = array<i64: 8, 32>}, {transform_indices = @transform_1, window_bounds = array<i64: 128, 32>}, {transform_indices = @transform_2, window_bounds = array<i64: 1, 128>}, {transform_indices = @transform_3, window_bounds = array<i64: 8, 128>}, {transform_indices = @transform_4, window_bounds = array<i64: 8, 128>}, {transform_indices = @transform_5, window_bounds = array<i64: 8, 128>}, {transform_indices = @transform_6, window_bounds = array<i64: 8, 128>}]} {
    %c0_i32 = arith.constant 0 : i32
    %0 = arith.cmpi eq, %arg1, %c0_i32 : i32
    %1 = arith.extui %0 : i1 to i32
    %c0_i32_0 = arith.constant 0 : i32
    %2 = arith.cmpi ne, %1, %c0_i32_0 : i32
    scf.if %2 {
      %c0_23 = arith.constant 0 : index
      %c0_24 = arith.constant 0 : index
      %31 = vector.load %arg2[%c0_23, %c0_24] : memref<8x32xf32, #tpu.memory_space<vmem>>, vector<8x32xf32>
      %32 = arith.mulf %31, %31 : vector<8x32xf32>
      %cst_25 = arith.constant dense<0.000000e+00> : vector<8xf32>
      %33 = vector.multi_reduction <add>, %32, %cst_25 [1] : vector<8x32xf32> to vector<8xf32>
      %34 = vector.shape_cast %33 : vector<8xf32> to vector<8x1xf32>
      %c0_26 = arith.constant 0 : index
      %c0_27 = arith.constant 0 : index
      %35 = vector.load %arg9[%c0_26, %c0_27] : memref<8x1xf32, #tpu.memory_space<vmem>>, vector<8x1xf32>
      tpu.vector_store %arg9[%c0_26, %c0_27], %34 {strides = array<i32>} : memref<8x1xf32, #tpu.memory_space<vmem>>, vector<8x1xf32>,
      %cst_28 = arith.constant 0.000000e+00 : f32
      %36 = vector.broadcast %cst_28 : f32 to vector<8x128xf32>
      %c0_29 = arith.constant 0 : index
      %c0_30 = arith.constant 0 : index
      %37 = vector.load %arg8[%c0_29, %c0_30] : memref<8x128xf32, #tpu.memory_space<vmem>>, vector<8x128xf32>
      tpu.vector_store %arg8[%c0_29, %c0_30], %36 {strides = array<i32>} : memref<8x128xf32, #tpu.memory_space<vmem>>, vector<8x128xf32>,
    } else {
    }
    %c0 = arith.constant 0 : index
    %c0_1 = arith.constant 0 : index
    %3 = vector.load %arg2[%c0, %c0_1] : memref<8x32xf32, #tpu.memory_space<vmem>>, vector<8x32xf32>
    %c0_2 = arith.constant 0 : index
    %c0_3 = arith.constant 0 : index
    %4 = vector.load %arg3[%c0_2, %c0_3] : memref<128x32xf32, #tpu.memory_space<vmem>>, vector<128x32xf32>
    %cst = arith.constant dense<0.000000e+00> : vector<8x128xf32>
    %5 = tpu.matmul %3, %4, %cst {dimension_numbers = #tpu.dot_dimension_numbers<[1], [1], [0], [0], [0, 0, 1, 0], [], []>, precision = #tpu.contract_precision<fp32>} : vector<8x32xf32>, vector<128x32xf32>, vector<8x128xf32> -> vector<8x128xf32>
    %c0_4 = arith.constant 0 : index
    %c0_5 = arith.constant 0 : index
    %6 = vector.load %arg9[%c0_4, %c0_5] : memref<8x1xf32, #tpu.memory_space<vmem>>, vector<8x1xf32>
    %c0_6 = arith.constant 0 : index
    %c0_7 = arith.constant 0 : index
    %7 = vector.load %arg4[%c0_6, %c0_7] : memref<1x128xf32, #tpu.memory_space<vmem>>, vector<1x128xf32>
    %8 = vector.broadcast %6 : vector<8x1xf32> to vector<8x128xf32>
    %9 = vector.broadcast %7 : vector<1x128xf32> to vector<8x128xf32>
    %10 = arith.addf %8, %9 : vector<8x128xf32>
    %cst_8 = arith.constant 2.000000e+00 : f32
    %11 = vector.broadcast %cst_8 : f32 to vector<8x128xf32>
    %12 = arith.mulf %11, %5 : vector<8x128xf32>
    %13 = arith.subf %10, %12 : vector<8x128xf32>
    %c0_9 = arith.constant 0 : index
    %c0_10 = arith.constant 0 : index
    %14 = vector.load %arg5[%c0_9, %c0_10] : memref<8x128xf32, #tpu.memory_space<vmem>>, vector<8x128xf32>
    %cst_11 = arith.constant 2.500000e-01 : f32
    %15 = vector.broadcast %cst_11 : f32 to vector<8x128xf32>
    %16 = arith.mulf %15, %14 : vector<8x128xf32>
    %c0_12 = arith.constant 0 : index
    %c0_13 = arith.constant 0 : index
    %17 = vector.load %arg6[%c0_12, %c0_13] : memref<8x128xf32, #tpu.memory_space<vmem>>, vector<8x128xf32>
    %cst_14 = arith.constant 0.144337565 : f32
    %18 = vector.broadcast %cst_14 : f32 to vector<8x128xf32>
    %19 = arith.mulf %18, %17 : vector<8x128xf32>
    %20 = arith.addf %16, %19 : vector<8x128xf32>
    %c0_15 = arith.constant 0 : index
    %c0_16 = arith.constant 0 : index
    %21 = vector.load %arg7[%c0_15, %c0_16] : memref<8x128xf32, #tpu.memory_space<vmem>>, vector<8x128xf32>
    tpu.vector_store %arg7[%c0_15, %c0_16], %20 {strides = array<i32>} : memref<8x128xf32, #tpu.memory_space<vmem>>, vector<8x128xf32>,
    %cst_17 = arith.constant 0.00999999977 : f32
    %22 = vector.broadcast %cst_17 : f32 to vector<8x128xf32>
    %23 = arith.mulf %22, %19 : vector<8x128xf32>
    %24 = arith.subf %16, %23 : vector<8x128xf32>
    %25 = arith.mulf %13, %24 : vector<8x128xf32>
    %cst_18 = arith.constant dense<0.000000e+00> : vector<128xf32>
    %26 = vector.multi_reduction <add>, %25, %cst_18 [0] : vector<8x128xf32> to vector<128xf32>
    %27 = vector.shape_cast %26 : vector<128xf32> to vector<1x128xf32>
    %c0_19 = arith.constant 0 : index
    %c0_20 = arith.constant 0 : index
    %28 = vector.load %arg8[%c0_19, %c0_20] : memref<8x128xf32, #tpu.memory_space<vmem>>, vector<1x128xf32>
    %29 = arith.addf %28, %27 : vector<1x128xf32>
    %c0_21 = arith.constant 0 : index
    %c0_22 = arith.constant 0 : index
    %30 = vector.load %arg8[%c0_21, %c0_22] : memref<8x128xf32, #tpu.memory_space<vmem>>, vector<1x128xf32>
    tpu.vector_store %arg8[%c0_21, %c0_22], %29 {strides = array<i32>} : memref<8x128xf32, #tpu.memory_space<vmem>>, vector<1x128xf32>,
    return
  }
  func.func @transform_0(%arg0: i32, %arg1: i32) -> (i32, i32) {
    %c0_i32 = arith.constant 0 : i32
    %c0_i32_0 = arith.constant 0 : i32
    return %arg0, %c0_i32 : i32, i32
  }
  func.func @transform_1(%arg0: i32, %arg1: i32) -> (i32, i32) {
    %c0_i32 = arith.constant 0 : i32
    %c0_i32_0 = arith.constant 0 : i32
    return %arg1, %c0_i32 : i32, i32
  }
  func.func @transform_2(%arg0: i32, %arg1: i32) -> (i32, i32) {
    %c0_i32 = arith.constant 0 : i32
    %c0_i32_0 = arith.constant 0 : i32
    return %c0_i32, %arg1 : i32, i32
  }
  func.func @transform_3(%arg0: i32, %arg1: i32) -> (i32, i32) {
    %c0_i32 = arith.constant 0 : i32
    return %arg0, %arg1 : i32, i32
  }
  func.func @transform_4(%arg0: i32, %arg1: i32) -> (i32, i32) {
    %c0_i32 = arith.constant 0 : i32
    return %arg0, %arg1 : i32, i32
  }
  func.func @transform_5(%arg0: i32, %arg1: i32) -> (i32, i32) {
    %c0_i32 = arith.constant 0 : i32
    return %arg0, %arg1 : i32, i32
  }
  func.func @transform_6(%arg0: i32, %arg1: i32) -> (i32, i32) {
    %c0_i32 = arith.constant 0 : i32
    %c0_i32_0 = arith.constant 0 : i32
    return %arg0, %c0_i32 : i32, i32
  }
}

</mosaic_0001>

<bundles_post_ra>
// kernel: tpu_custom_call.1
= control target key start
LH: loop header
LB: loop body
LE: loop exit
PB: predicated region body
PF: predicated region fallthrough
CT: control target
= control target key end

     0   :  { %12 = vsyncpa [#allocation4], 0  ;;  %vm30_vm0 = vcmask 261120   ;;  %s928_s0 = inlined_call_operand.vmem [shape: f32[8,32], index: 0, kind: input, shape index: {}]   ;;  %s929_s1 = inlined_call_operand.vmem [shape: f32[128,32], index: 1, kind: input, shape index: {}]   ;;  %s930_s2 = inlined_call_operand.vmem [shape: f32[1,128], index: 2, kind: input, shape index: {}]   ;;  %s931_s3 = inlined_call_operand.vmem [shape: f32[8,128], index: 3, kind: input, shape index: {}]   ;;  %s932_s4 = inlined_call_operand.vmem [shape: f32[8,128], index: 4, kind: input, shape index: {}]   ;;  %s933_s5 = inlined_call_operand.hbm [shape: f32[8,128], index: 5, kind: output, shape index: {0}]   ;;  %s934_s6 = inlined_call_operand.hbm [shape: f32[8,128], index: 6, kind: output, shape index: {1}]  }
   0x1   :  { %v53_v0 = vld [vmem:[%s929_s1 + $0x78] sm:$0xff]  ;;  %v52_v1 = vld [vmem:[%s929_s1 + $0x70] sm:$0xff]  ;;  %v51_v2 = vld [vmem:[%s929_s1 + $0x68] sm:$0xff] }
   0x2   :  { %v104_v3 = vsel %vm30_vm0, %v53_v0, 0  ;;  %v101_v4 = vsel %vm30_vm0, %v52_v1, 0  ;;  %v98_v5 = vsel %vm30_vm0, %v51_v2, 0  ;;  %v50_v6 = vld [vmem:[%s929_s1 + $0x60] sm:$0xff]  ;;  %v49_v7 = vld [vmem:[%s929_s1 + $0x58] sm:$0xff]  ;;  %v48_v19 = vld [vmem:[%s929_s1 + $0x50] sm:$0xff] }
   0x3   :  { %v628_v8 = vld [vmem:[%s928_s0] sm:$0xff]  ;;  %v630_v9 = vand.u32 4294901760, %v104_v3  ;;  %v632_v10 = vand.u32 4294901760, %v101_v4  ;;  %v634_v11 = vand.u32 4294901760, %v98_v5  ;;  %v95_v12 = vsel %vm30_vm0, %v50_v6, 0 }
   0x4   :  { %v637_v13 = vand.u32 4294901760, %v95_v12  ;;  %v29_v14 = vmul.f32 %v628_v8, %v628_v8  ;;  %v92_v18 = vsel %vm30_vm0, %v49_v7, 0 }
   0x5   :  { %107 = vmatpush.xpose.msra.mxu0 %v630_v9  ;;  %v643_v15 = vsub.f32 %v104_v3, %v630_v9  ;;  %v646_v16 = vsub.f32 %v101_v4, %v632_v10  ;;  %v649_v17 = vsub.f32 %v98_v5, %v634_v11  ;;  %303 = vmatpush.xpose.msra.mxu3 %v630_v9 }
   0x6   :  { %13 = vsyncpa [#allocation6], 0  ;;  %v31_v20 = vsel %vm30_vm0, %v29_v14, 0.0  ;;  %v660_v23 = vand.u32 4294901760, %v92_v18  ;;  %v89_v24 = vsel %vm30_vm0, %v48_v19, 0  ;;  %v672_v28 = vsub.f32 %v95_v12, %v637_v13  ;;  %v47_v29 = vld [vmem:[%s929_s1 + $0x48] sm:$0xff] }
   0x7   :  { %v149_v21 = vand.u32 4294901760, %v643_v15  ;;  %v155_v22 = vand.u32 4294901760, %v646_v16  ;;  %32 = vadd.xlane.f32.xlu0 %v31_v20  ;;  %250 = vmatpush.xpose.msra.mxu2 %v643_v15  ;;  %v161_v27 = vand.u32 4294901760, %v649_v17  ;;  %v679_v31 = vand.u32 4294901760, %v89_v24  ;;  %v46_v37 = vld [vmem:[%s929_s1 + $0x40] sm:$0xff]  ;;  %v45_v44 = vld [vmem:[%s929_s1 + $0x38] sm:$0xff] }
   0x8   :  { %v86_v32 = vsel %vm30_vm0, %v47_v29, 0  ;;  %v167_v35 = vand.u32 4294901760, %v672_v28  ;;  %v688_v36 = vsub.f32 %v92_v18, %v660_v23  ;;  %v83_v43 = vsel %vm30_vm0, %v46_v37, 0  ;;  %v44_v51 = vld [vmem:[%s929_s1 + $0x30] sm:$0xff]  ;;  %v43_v58 = vld [vmem:[%s929_s1 + $0x28] sm:$0xff]  ;;  %v42_v1 = vld [vmem:[%s929_s1 + $0x20] sm:$0xff] }
   0x9   :  { %109 = vmatpush.xpose.msra.mxu0 %v632_v10  ;;  %v150_v25 = vsub.f32 %v643_v15, %v149_v21  ;;  %v156_v26 = vsub.f32 %v646_v16, %v155_v22  ;;  %305 = vmatpush.xpose.msra.mxu3 %v632_v10  ;;  %v162_v34 = vsub.f32 %v649_v17, %v161_v27  ;;  %v695_v38 = vand.u32 4294901760, %v86_v32  ;;  %v41_v12 = vld [vmem:[%s929_s1 + $0x18] sm:$0xff]  ;;  %s569_s0 = smov [#allocation3]   ;;  %s485_s12 = sshll.u32 %s933_s5, 4  ;;  %s486_s12 = int_to_ptr.hbm [resolvable:$true] %s485_s12 }
   0xa   :  { %v698_v39 = vsub.f32 %v89_v24, %v679_v31  ;;  %v168_v41 = vsub.f32 %v672_v28, %v167_v35  ;;  %v173_v42 = vand.u32 4294901760, %v688_v36  ;;  %v719_v49 = vand.u32 4294901760, %v83_v43  ;;  %s483_s9 = sshll.u32 %s569_s0, 4  ;;  %s571_s5 = smov [#allocation5]   ;;  %s484_s9 = int_to_ptr.vmem [resolvable:$true] %s483_s9 }
   0xb   :  { %v151_v30 = vand.u32 4294901760, %v150_v25  ;;  %253 = vmatpush.xpose.msra.mxu2 %v646_v16  ;;  %v157_v33 = vand.u32 4294901760, %v156_v26  ;;  %v163_v40 = vand.u32 4294901760, %v162_v34  ;;  %v713_v46 = vsub.f32 %v86_v32, %v695_v38  ;;  %v40_v26 = vld [vmem:[%s929_s1 + $0x10] sm:$0xff]  ;;  %s494_s13 = sshll.u32 %s571_s5, 4  ;;  %s496_s15 = sshll.u32 %s934_s6, 4  ;;  %s495_s13 = int_to_ptr.vmem [resolvable:$true] %s494_s13  ;;  %s497_s15 = int_to_ptr.hbm [resolvable:$true] %s496_s15 }
   0xc   :  { %v179_v45 = vand.u32 4294901760, %v698_v39  ;;  %v169_v47 = vand.u32 4294901760, %v168_v41  ;;  %v174_v48 = vsub.f32 %v688_v36, %v173_v42  ;;  %v80_v50 = vsel %vm30_vm0, %v45_v44, 0 }
   0xd   :  { %152 = vmatpush.xpose.msra.mxu1 %v151_v30  ;;  %111 = vmatpush.xpose.msra.mxu0 %v634_v11  ;;  %v185_v53 = vand.u32 4294901760, %v713_v46  ;;  %v732_v55 = vand.u32 4294901760, %v80_v50  ;;  %v735_v56 = vsub.f32 %v83_v43, %v719_v49  ;;  %v77_v57 = vsel %vm30_vm0, %v44_v51, 0  ;;  %v38_v51 = vld [vmem:[%s929_s1] sm:$0xff] }
   0xe   :  { %307 = vmatpush.xpose.msra.mxu3 %v634_v11  ;;  %v180_v52 = vsub.f32 %v698_v39, %v179_v45  ;;  %v175_v54 = vand.u32 4294901760, %v174_v48  ;;  %v748_v62 = vand.u32 4294901760, %v77_v57  ;;  %v74_v0 = vsel %vm30_vm0, %v43_v58, 0 }
   0xf   :  { %256 = vmatpush.xpose.msra.mxu2 %v649_v17  ;;  %v186_v60 = vsub.f32 %v713_v46, %v185_v53  ;;  %v191_v61 = vand.u32 4294901760, %v735_v56  ;;  %v751_v63 = vsub.f32 %v80_v50, %v732_v55  ;;  %v759_v2 = vand.u32 4294901760, %v74_v0 }
  0x10   :  { %v181_v59 = vand.u32 4294901760, %v180_v52  ;;  %v71_v3 = vsel %vm30_vm0, %v42_v1, 0  ;;  %v768_v7 = vsub.f32 %v77_v57, %v748_v62  ;;  %v68_v25 = vsel %vm30_vm0, %v41_v12, 0 }
  0x11   :  { %158 = vmatpush.xpose.msra.mxu1 %v157_v33  ;;  %113 = vmatpush.xpose.msra.mxu0 %v637_v13  ;;  %v187_v4 = vand.u32 4294901760, %v186_v60  ;;  %v192_v5 = vsub.f32 %v735_v56, %v191_v61  ;;  %v197_v6 = vand.u32 4294901760, %v751_v63  ;;  %v775_v14 = vand.u32 4294901760, %v71_v3 }
  0x12   :  { %309 = vmatpush.xpose.msra.mxu3 %v637_v13  ;;  %v203_v20 = vand.u32 4294901760, %v768_v7  ;;  %v783_v24 = vsub.f32 %v74_v0, %v759_v2  ;;  %v799_v34 = vand.u32 4294901760, %v68_v25  ;;  %v65_v37 = vsel %vm30_vm0, %v40_v26, 0 }
  0x13   :  { %259 = vmatpush.xpose.msra.mxu2 %v672_v28  ;;  %v193_v18 = vand.u32 4294901760, %v192_v5  ;;  %v198_v19 = vsub.f32 %v751_v63, %v197_v6  ;;  %v792_v29 = vsub.f32 %v71_v3, %v775_v14  ;;  %v59_v60 = vsel %vm30_vm0, %v38_v51, 0 }
  0x14   :  { %v204_v32 = vsub.f32 %v768_v7, %v203_v20  ;;  %v209_v33 = vand.u32 4294901760, %v783_v24  ;;  %v815_v48 = vsub.f32 %v68_v25, %v799_v34  ;;  %v56_v15 = vsel %vm30_vm0, %v628_v8, 0 }
  0x15   :  { %164 = vmatpush.xpose.msra.mxu1 %v163_v40  ;;  %115 = vmatpush.xpose.msra.mxu0 %v660_v23  ;;  %v199_v30 = vand.u32 4294901760, %v198_v19  ;;  %v39_v40 = vld [vmem:[%s929_s1 + $0x8] sm:$0xff]  ;;  %v215_v41 = vand.u32 4294901760, %v792_v29  ;;  %v138_v16 = vand.u32 4294901760, %v56_v15  ;;  %v568_v8 = vmov 0  }
  0x16   :  { %311 = vmatpush.xpose.msra.mxu3 %v660_v23  ;;  %v205_v43 = vand.u32 4294901760, %v204_v32  ;;  %v210_v44 = vsub.f32 %v783_v24, %v209_v33  ;;  %v62_v50 = vsel %vm30_vm0, %v39_v40, 0  ;;  %v221_v57 = vand.u32 4294901760, %v815_v48  ;;  %514 = vset.pattern.permute.xlu0 %v568_v8 }
  0x17   :  { %262 = vmatpush.xpose.msra.mxu2 %v688_v36  ;;  %v216_v52 = vsub.f32 %v792_v29, %v215_v41  ;;  %v828_v58 = vand.u32 4294901760, %v62_v50  ;;  %vm34_vm1 = vcmask 7168  }
  0x18   :  { %v222_v1 = vsub.f32 %v815_v48, %v221_v57 }
  0x19   :  { %170 = vmatpush.xpose.msra.mxu1 %v169_v47  ;;  %117 = vmatpush.xpose.msra.mxu0 %v679_v31  ;;  %v812_v47 = vand.u32 4294901760, %v65_v37  ;;  %v217_v0 = vand.u32 4294901760, %v216_v52  ;;  %v844_v5 = vsub.f32 %v62_v50, %v828_v58 }
  0x1a   :  { %313 = vmatpush.xpose.msra.mxu3 %v679_v31  ;;  %v223_v12 = vand.u32 4294901760, %v222_v1 }
  0x1b   :  { %265 = vmatpush.xpose.msra.mxu2 %v698_v39  ;;  %v233_v19 = vand.u32 4294901760, %v844_v5 }
  0x1d   :  { %176 = vmatpush.xpose.msra.mxu1 %v175_v54  ;;  %119 = vmatpush.xpose.msra.mxu0 %v695_v38  ;;  %v211_v54 = vand.u32 4294901760, %v210_v44 }
  0x1e   :  { %315 = vmatpush.xpose.msra.mxu3 %v695_v38 }
  0x1f   :  { %268 = vmatpush.xpose.msra.mxu2 %v713_v46 }
  0x21   :  { %182 = vmatpush.xpose.msra.mxu1 %v181_v59  ;;  %121 = vmatpush.xpose.msra.mxu0 %v719_v49  ;;  %v831_v59 = vsub.f32 %v65_v37, %v812_v47 }
  0x22   :  { %317 = vmatpush.xpose.msra.mxu3 %v719_v49 }
  0x23   :  { %271 = vmatpush.xpose.msra.mxu2 %v735_v56  ;;  %v227_v3 = vand.u32 4294901760, %v831_v59 }
  0x25   :  { %188 = vmatpush.xpose.msra.mxu1 %v187_v4  ;;  %123 = vmatpush.xpose.msra.mxu0 %v732_v55  ;;  %v841_v4 = vand.u32 4294901760, %v59_v60 }
  0x26   :  { %319 = vmatpush.xpose.msra.mxu3 %v732_v55 }
  0x27   :  { %274 = vmatpush.xpose.msra.mxu2 %v751_v63  ;;  %v854_v25 = vsub.f32 %v59_v60, %v841_v4 }
  0x29   :  { %194 = vmatpush.xpose.msra.mxu1 %v193_v18  ;;  %125 = vmatpush.xpose.msra.mxu0 %v748_v62  ;;  %v228_v18 = vsub.f32 %v831_v59, %v227_v3  ;;  %v239_v32 = vand.u32 4294901760, %v854_v25 }
  0x2a   :  { %321 = vmatpush.xpose.msra.mxu3 %v748_v62 }
  0x2b   :  { %277 = vmatpush.xpose.msra.mxu2 %v768_v7  ;;  %v229_v26 = vand.u32 4294901760, %v228_v18  ;;  %v240_v40 = vsub.f32 %v854_v25, %v239_v32 }
  0x2d   :  { %200 = vmatpush.xpose.msra.mxu1 %v199_v30  ;;  %127 = vmatpush.xpose.msra.mxu0 %v759_v2  ;;  %v234_v30 = vsub.f32 %v844_v5, %v233_v19 }
  0x2e   :  { %323 = vmatpush.xpose.msra.mxu3 %v759_v2 }
  0x2f   :  { %280 = vmatpush.xpose.msra.mxu2 %v783_v24  ;;  %v235_v37 = vand.u32 4294901760, %v234_v30 }
  0x31   :  { %206 = vmatpush.xpose.msra.mxu1 %v205_v43  ;;  %129 = vmatpush.xpose.msra.mxu0 %v775_v14  ;;  %v241_v43 = vand.u32 4294901760, %v240_v40 }
  0x32   :  { %325 = vmatpush.xpose.msra.mxu3 %v775_v14 }
  0x33   :  { %283 = vmatpush.xpose.msra.mxu2 %v792_v29 }
  0x35   :  { %212 = vmatpush.xpose.msra.mxu1 %v211_v54  ;;  %131 = vmatpush.xpose.msra.mxu0 %v799_v34 }
  0x36   :  { %327 = vmatpush.xpose.msra.mxu3 %v799_v34 }
  0x37   :  { %286 = vmatpush.xpose.msra.mxu2 %v815_v48 }
  0x39   :  { %218 = vmatpush.xpose.msra.mxu1 %v217_v0  ;;  %133 = vmatpush.xpose.msra.mxu0 %v812_v47 }
  0x3a   :  { %329 = vmatpush.xpose.msra.mxu3 %v812_v47 }
  0x3b   :  { %289 = vmatpush.xpose.msra.mxu2 %v831_v59 }
  0x3d   :  { %224 = vmatpush.xpose.msra.mxu1 %v223_v12  ;;  %135 = vmatpush.xpose.msra.mxu0 %v828_v58 }
  0x3e   :  { %331 = vmatpush.xpose.msra.mxu3 %v828_v58 }
  0x3f   :  { %292 = vmatpush.xpose.msra.mxu2 %v844_v5 }
  0x41   :  { %230 = vmatpush.xpose.msra.mxu1 %v229_v26  ;;  %137 = vmatpush.xpose.msra.mxu0 %v841_v4 }
  0x42   :  { %333 = vmatpush.xpose.msra.mxu3 %v841_v4 }
  0x43   :  { %295 = vmatpush.xpose.msra.mxu2 %v854_v25 }
  0x45   :  { %344 = vmatpush.xpose.msrb.mxu0 %v149_v21  ;;  %236 = vmatpush.xpose.msra.mxu1 %v235_v37  ;;  %v139_v21 = vsub.f32 %v56_v15, %v138_v16 }
  0x47   :  { %298 = vmatmul.f32.vlgmr.msra.gmra.mxu2 %v139_v21 }
  0x49   :  { %348 = vmatpush.xpose.msrb.mxu0 %v155_v22  ;;  %242 = vmatpush.xpose.msra.mxu1 %v241_v43  ;;  %v462_v22 = vld [vmem:[%s932_s4] sm:$0xff] }
  0x4a   :  { %v463_v28 = vmul.f32 0.14433756, %v462_v22 }
  0x4c   :  { %244 = vmatmul.f32.vlgmr.msra.gmra.mxu1 %v138_v16 }
  0x4d   :  { %411 = vmatpush.xpose.msrb.mxu1 %v630_v9  ;;  %352 = vmatpush.xpose.msrb.mxu0 %v161_v27  ;;  %v140_v9 = vand.u32 4294901760, %v139_v21 }
  0x4f   :  { %337 = vmatmul.f32.vlgmr.msra.gmra.mxu3 %v140_v9 }
  0x51   :  { %413 = vmatpush.xpose.msrb.mxu1 %v632_v10  ;;  %356 = vmatpush.xpose.msrb.mxu0 %v167_v35  ;;  %v141_v10 = vsub.f32 %v139_v21, %v140_v9  ;;  %v570_v35 = vmov 0.0  }
  0x52   :  { %36 = vst [vmem:[#allocation5] sm:$0xff] %v570_v35 }
  0x55   :  { %415 = vmatpush.xpose.msrb.mxu1 %v634_v11  ;;  %360 = vmatpush.xpose.msrb.mxu0 %v173_v42  ;;  %v142_v11 = vand.u32 4294901760, %v141_v10 }
  0x57   :  { %143 = vmatmul.f32.vlgmr.msra.gmra.mxu0 %v142_v11 }
  0x59   :  { %417 = vmatpush.xpose.msrb.mxu1 %v637_v13  ;;  %364 = vmatpush.xpose.msrb.mxu0 %v179_v45 }
  0x5d   :  { %419 = vmatpush.xpose.msrb.mxu1 %v660_v23  ;;  %368 = vmatpush.xpose.msrb.mxu0 %v185_v53  ;;  %v460_v23 = vld [vmem:[%s931_s3] sm:$0xff] }
  0x5e   :  { %v461_v27 = vmul.f32 0.25, %v460_v23 }
  0x61   :  { %421 = vmatpush.xpose.msrb.mxu1 %v679_v31  ;;  %372 = vmatpush.xpose.msrb.mxu0 %v191_v61  ;;  %v464_v31 = vadd.f32 %v463_v28, %v461_v27 }
  0x63   :  { %465 = vst [vmem:[#allocation3] sm:$0xff] %v464_v31 }
  0x64   :  { %488 = dma.vmem_to_hbm [thread:$0]  %s484_s9, 128, %s486_s12, [#allocation4]  }
  0x65   :  { %423 = vmatpush.xpose.msrb.mxu1 %v695_v38  ;;  %376 = vmatpush.xpose.msrb.mxu0 %v197_v6 }
  0x69   :  { %425 = vmatpush.xpose.msrb.mxu1 %v719_v49  ;;  %380 = vmatpush.xpose.msrb.mxu0 %v203_v20 }
  0x6d   :  { %427 = vmatpush.xpose.msrb.mxu1 %v732_v55  ;;  %384 = vmatpush.xpose.msrb.mxu0 %v209_v33  ;;  %v515_v55 = vld [vmem:[%s930_s2] ss:$0 sm:$0xff] }
  0x71   :  { %429 = vmatpush.xpose.msrb.mxu1 %v748_v62  ;;  %388 = vmatpush.xpose.msrb.mxu0 %v215_v41  ;;  %v466_v62 = vmul.f32 0.01, %v463_v28 }
  0x75   :  { %431 = vmatpush.xpose.msrb.mxu1 %v759_v2  ;;  %392 = vmatpush.xpose.msrb.mxu0 %v221_v57 }
  0x79   :  { %433 = vmatpush.xpose.msrb.mxu1 %v775_v14  ;;  %396 = vmatpush.xpose.msrb.mxu0 %v227_v3  ;;  %v467_v14 = vsub.f32 %v461_v27, %v466_v62 }
  0x7a   :  { %v33_v13 = vpop.xlane.xlu0 %32 }
  0x7b   :  { %35 = vst.msk [vmem:[#allocation2] sm:$0xff] %vm34_vm1, %v33_v13 }
  0x7d   :  { %435 = vmatpush.xpose.msrb.mxu1 %v799_v34  ;;  %400 = vmatpush.xpose.msrb.mxu0 %v233_v19 }
  0x81   :  { %437 = vmatpush.xpose.msrb.mxu1 %v812_v47  ;;  %404 = vmatpush.xpose.msrb.mxu0 %v239_v32  ;;  %v475_v47 = vld [vmem:[#allocation5] sm:$0x1] }
  0x82   :  { %v447_v17 = vld [vmem:[#allocation2] sm:$0xff] }
  0x83   :  { %451 = vperm.xlu0 %514, %v447_v17  }
  0x84   :  { %406 = vmatmul.f32.vlgmr.msrb.gmra.mxu0 %v138_v16 }
  0x85   :  { %439 = vmatpush.xpose.msrb.mxu1 %v828_v58 }
  0x89   :  { %441 = vmatpush.xpose.msrb.mxu1 %v841_v4 }
  0x8c   :  { %443 = vmatmul.f32.vlgmr.msrb.gmra.mxu1 %v138_v16 }
  0xc9   :  { %v245_v36 = vpop.f32.mrf.mxu1 }
  0xca   :  { %v299_v42 = vpop.f32.mrf.mxu2 }
  0xd2   :  { %v338_v46 = vpop.f32.mrf.mxu3 }
  0xd4   :  { %v144_v38 = vpop.f32.mrf.mxu0 }
  0xd5   :  { %v246_v39 = vadd.f32 %v245_v36, %v144_v38 }
  0xd7   :  { %v300_v45 = vadd.f32 %v299_v42, %v246_v39 }
  0xd9   :  { %v339_v49 = vadd.f32 %v338_v46, %v300_v45 }
  0xf5   :  { %v452_v56 = vpop.permute.xlu0 %451 }
  0xf6   :  { %v457_v6 = vadd.f32 %v515_v55, %v452_v56 }
 0x101   :  { %v407_v53 = vpop.f32.mrf.mxu0 }
 0x102   :  { %v408_v61 = vadd.f32 %v407_v53, %v339_v49 }
 0x109   :  { %v444_v63 = vpop.f32.mrf.mxu1 }
 0x10a   :  { %v445_v2 = vadd.f32 %v444_v63, %v408_v61 }
 0x10c   :  { %v458_v7 = vmul.f32 2.0, %v445_v2 }
 0x10e   :  { %v459_v20 = vsub.f32 %v457_v6, %v458_v7 }
 0x110   :  { %v468_v24 = vmul.f32 %v467_v14, %v459_v20 }
 0x112   :  { %v469_v29 = vrot.slane %v468_v24, 4 }
 0x114   :  { %v470_v33 = vadd.f32 %v469_v29, %v468_v24 }
 0x116   :  { %v471_v34 = vrot.slane %v470_v33, 2 }
 0x118   :  { %v472_v41 = vadd.f32 %v471_v34, %v470_v33 }
 0x11a   :  { %v473_v44 = vrot.slane %v472_v41, 1 }
 0x11c   :  { %v474_v48 = vadd.f32 %v473_v44, %v472_v41 }
 0x11e   :  { %v476_v50 = vadd.f32 %v475_v47, %v474_v48 }
 0x120   :  { %477 = vst [vmem:[#allocation5] sm:$0x1] %v476_v50 }
 0x121   :  { %499 = dma.vmem_to_hbm [thread:$0]  %s495_s13, 128, %s497_s15, [#allocation6]  }
 0x122   :  { %564 = dma.done.wait [#allocation4], 128  }
 0x123   :  { %565 = vsyncadd [#allocation4], 4294967168 }
 0x124   :  { %566 = dma.done.wait [#allocation6], 128  }
 0x125   :  { %567 = vsyncadd [#allocation6], 4294967168 }
 0x126   :  { %508 = vsyncpa [#allocation4], 1 }
 0x127   :  { %509 = vsyncpa [#allocation6], 1 }

</bundles_post_ra>
